<compile_context>
chip_gen: v7x
topology: tpu7x:2x2x1
jax: 0.10.0
libtpu: 0.0.40
codegen_flags: <defaults>
</compile_context>

<pallas_src>
import math

import jax
import jax.numpy as jnp
from jax.experimental import pallas as pl
from jax.experimental.pallas import tpu as pltpu


def _round_up(x, m):
    return ((x + m - 1) // m) * m


def _round_down(x, m):
    return (x // m) * m


def _make_kernel(seq_len, seq_block):
    rem = seq_len % seq_block  # static; masking code only emitted when needed

    def kernel(x_ref, w1_ref, b1_ref, w2_ref, b2_ref, o_ref, acc_ref):
        s = pl.program_id(1)
        ns = pl.num_programs(1)

        @pl.when(s == 0)
        def _init():
            acc_ref[...] = jnp.zeros_like(acc_ref)

        # Upcast only the current (bt, ts, D) slab to f32 and fold it into the
        # running sequence sum; the f32 temp is bounded by the seq tile, not S.
        x = x_ref[...].astype(jnp.float32)
        if rem:
            # Zero padded sequence positions of the final partial seq tile.
            valid = jnp.where(s == ns - 1, rem, seq_block)
            pos = jax.lax.broadcasted_iota(jnp.int32, x.shape, 1)
            x = jnp.where(pos < valid, x, 0.0)
        acc_ref[...] += jnp.sum(x, axis=1)                       # (bt, D) f32

        @pl.when(s == ns - 1)
        def _finalize():
            # 1/S is folded into w1_ref, so acc @ w1 == mean(x) @ W1.
            h = jnp.dot(acc_ref[...], w1_ref[...],
                        preferred_element_type=jnp.float32) + b1_ref[...]
            h = jnp.maximum(h, 0.0)                              # ReLU, (bt, H)
            # fc2 (K=H, N=1) on the VPU: broadcast multiply + lane reduce.
            out = jnp.sum(h * w2_ref[...], axis=-1)              # (bt,)
            o_ref[...] = out.reshape(1, -1) + b2_ref[...]        # lane-dense

    return kernel


def sent_regressor_forward(enc_src, w1, b1, w2, b2, *,
                           block_b=None, block_s=None,
                           transport_dtype=jnp.bfloat16,
                           vmem_budget_bytes=24 * 1024 * 1024):
    """enc_src: (B, S, 300). Returns (B,) (scalar if B == 1), like torch .squeeze()."""
    B, S, D = enc_src.shape
    H = w1.shape[1]

    # bf16 transport halves HBM bytes for this memory-bound kernel; the kernel
    # upcasts to f32 before any reduction/matmul.
    x = enc_src.astype(transport_dtype)
    in_itemsize = jnp.dtype(transport_dtype).itemsize

    # Fold the mean's 1/S into W1 once; keep params in f32, kernel layouts.
    w1_scaled = (w1 * (1.0 / S)).astype(jnp.float32)             # (D, H)
    b1_row = b1.reshape(1, H).astype(jnp.float32)
    w2_row = w2.reshape(1, H).astype(jnp.float32)
    b2_2d = b2.reshape(1, 1).astype(jnp.float32)

    # --- tile sizing --------------------------------------------------------
    # Sequence tile: full S when small, else a multiple of 8 (tail masked).
    ts = block_s if block_s is not None else (S if S <= 64 else 64)
    ts = min(ts, S)
    if ts != S:
        ts = max(8, _round_down(ts, 8))

    if block_b is None:
        d_pad = _round_up(D, 128)                                # lane padding
        per_row = (2 * ts * d_pad * in_itemsize                  # 2x input buf
                   + ts * d_pad * 4                              # f32 upcast
                   + d_pad * 4                                   # acc scratch
                   + 16)                                         # out buffers
        bt = _round_down(vmem_budget_bytes // per_row, 128)
        bt = max(128, min(bt, 2048))
    else:
        bt = block_b
    if B >= 256:
        # Keep >= 2 batch grid steps so both v7x TensorCores get work.
        bt = min(bt, _round_up((B + 1) // 2, 128))
    if B <= bt:
        bt = B                                                   # single tile
    g_b = pl.cdiv(B, bt)
    g_s = pl.cdiv(S, ts)

    cost = pl.CostEstimate(
        flops=2 * B * S * D + 2 * B * D * H + 4 * B * H,
        transcendentals=0,
        bytes_accessed=B * S * D * in_itemsize + (D * H + 2 * H + 1) * 4 + B * 4,
    )

    out_row = pl.pallas_call(
        _make_kernel(S, ts),
        out_shape=jax.ShapeDtypeStruct((1, g_b * bt), jnp.float32),
        grid=(g_b, g_s),
        in_specs=[
            pl.BlockSpec((bt, ts, D), lambda i, s: (i, s, 0)),   # batch/seq tile
            pl.BlockSpec((D, H), lambda i, s: (0, 0)),           # W1/S (resident)
            pl.BlockSpec((1, H), lambda i, s: (0, 0)),           # b1
            pl.BlockSpec((1, H), lambda i, s: (0, 0)),           # W2 as a row
            pl.BlockSpec((1, 1), lambda i, s: (0, 0)),           # b2
        ],
        out_specs=pl.BlockSpec((1, bt), lambda i, s: (0, i)),    # lane-dense row
        scratch_shapes=[pltpu.VMEM((bt, D), jnp.float32)],       # seq-sum acc
        compiler_params=pltpu.CompilerParams(
            dimension_semantics=("parallel", "arbitrary"),
            vmem_limit_bytes=48 * 1024 * 1024),
        cost_estimate=cost,
    )(x, w1_scaled, b1_row, w2_row, b2_2d)

    # Drop tail padding from a partial last batch tile; mimic torch .squeeze().
    return jnp.squeeze(out_row.reshape(-1)[:B])


def init_params(key, input_feat=300, output_dim=32):
    """Deterministic init mimicking nn.Linear's default U(-1/sqrt(fan_in), +)."""
    k1, k2, k3, k4 = jax.random.split(key, 4)
    bound1 = 1.0 / math.sqrt(input_feat)
    bound2 = 1.0 / math.sqrt(output_dim)
    w1 = jax.random.uniform(k1, (input_feat, output_dim), jnp.float32,
                            -bound1, bound1)
    b1 = jax.random.uniform(k2, (1, output_dim), jnp.float32, -bound1, bound1)
    w2 = jax.random.uniform(k3, (output_dim, 1), jnp.float32, -bound2, bound2)
    b2 = jax.random.uniform(k4, (1, 1), jnp.float32, -bound2, bound2)
    return w1, b1, w2, b2


if __name__ == "__main__":
    key = jax.random.PRNGKey(0)
    k_x, k_p = jax.random.split(key)

    # Small shapes consistent with the module: batch=2, seq=8, feat=300, H=32.
    B, S, D = 2, 8, 300
    OUTPUT_DIM = 32

    enc_src = jax.random.normal(k_x, (B, S, D), dtype=jnp.float32)
    w1, b1, w2, b2 = init_params(k_p, input_feat=D, output_dim=OUTPUT_DIM)

    out = sent_regressor_forward(enc_src, w1, b1, w2, b2)
    out = jax.block_until_ready(out)

    # Reference in plain JAX on the same bf16-rounded inputs the kernel ships.
    # Tolerance accounts for TPU default matmul precision differing between
    # the in-kernel MXU dot and XLA's dot (both ~bf16-pass level).
    x_ref = enc_src.astype(jnp.bfloat16).astype(jnp.float32)
    mean_embeds = jnp.mean(x_ref, axis=1)
    ref = jnp.squeeze(jnp.maximum(mean_embeds @ w1 + b1, 0.0) @ w2 + b2)

    assert out.shape == (B,), out.shape
    assert jnp.allclose(out, ref, atol=5e-3, rtol=5e-3), (out, ref)

    print("KERNEL_OK")
</pallas_src>

<mosaic_0001>
module attributes {stable_mosaic.version = 11 : i64} {
  func.func @kernel(%arg0: i32, %arg1: i32, %arg2: memref<2x8x300xbf16, #tpu.memory_space<vmem>>, %arg3: memref<300x32xf32, #tpu.memory_space<vmem>>, %arg4: memref<1x32xf32, #tpu.memory_space<vmem>>, %arg5: memref<1x32xf32, #tpu.memory_space<vmem>>, %arg6: memref<1x1xf32, #tpu.memory_space<vmem>>, %arg7: memref<1x2xf32, #tpu.memory_space<vmem>>, %arg8: memref<2x300xf32, #tpu.memory_space<vmem>>) attributes {dimension_semantics = [#tpu.dimension_semantics<parallel>, #tpu.dimension_semantics<arbitrary>], iteration_bounds = array<i64: 1, 1>, scalar_prefetch = 0 : i64, scratch_operands = 1 : i64, tpu.core_type = #tpu.core_type<tc>, window_params = [{transform_indices = @transform_0, window_bounds = array<i64: 2, 8, 300>}, {pipeline_mode = #tpu.pipeline_mode<synchronous>, transform_indices = @transform_1, window_bounds = array<i64: 300, 32>}, {pipeline_mode = #tpu.pipeline_mode<synchronous>, transform_indices = @transform_2, window_bounds = array<i64: 1, 32>}, {pipeline_mode = #tpu.pipeline_mode<synchronous>, transform_indices = @transform_3, window_bounds = array<i64: 1, 32>}, {pipeline_mode = #tpu.pipeline_mode<synchronous>, transform_indices = @transform_4, window_bounds = array<i64: 1, 1>}, {transform_indices = @transform_5, window_bounds = array<i64: 1, 2>}]} {
    %c0_i32 = arith.constant 0 : i32
    %0 = arith.cmpi eq, %arg1, %c0_i32 : i32
    %1 = arith.extui %0 : i1 to i32
    %c0_i32_0 = arith.constant 0 : i32
    %2 = arith.cmpi ne, %1, %c0_i32_0 : i32
    scf.if %2 {
      %cst_9 = arith.constant 0.000000e+00 : f32
      %12 = vector.broadcast %cst_9 : f32 to vector<2x300xf32>
      %c0_10 = arith.constant 0 : index
      %c0_11 = arith.constant 0 : index
      %13 = vector.load %arg8[%c0_10, %c0_11] : memref<2x300xf32, #tpu.memory_space<vmem>>, vector<2x300xf32>
      tpu.vector_store %arg8[%c0_10, %c0_11], %12 {strides = array<i32>} : memref<2x300xf32, #tpu.memory_space<vmem>>, vector<2x300xf32>,
    } else {
    }
    %c0 = arith.constant 0 : index
    %c0_1 = arith.constant 0 : index
    %c0_2 = arith.constant 0 : index
    %3 = vector.load %arg2[%c0, %c0_1, %c0_2] : memref<2x8x300xbf16, #tpu.memory_space<vmem>>, vector<2x8x300xbf16>
    %4 = arith.extf %3 : vector<2x8x300xbf16> to vector<2x8x300xf32>
    %c0_3 = arith.constant 0 : index
    %c0_4 = arith.constant 0 : index
    %5 = vector.load %arg8[%c0_3, %c0_4] : memref<2x300xf32, #tpu.memory_space<vmem>>, vector<2x300xf32>
    %cst = arith.constant dense<0.000000e+00> : vector<2x300xf32>
    %6 = vector.multi_reduction <add>, %4, %cst [1] : vector<2x8x300xf32> to vector<2x300xf32>
    %7 = arith.addf %5, %6 : vector<2x300xf32>
    %c0_5 = arith.constant 0 : index
    %c0_6 = arith.constant 0 : index
    %8 = vector.load %arg8[%c0_5, %c0_6] : memref<2x300xf32, #tpu.memory_space<vmem>>, vector<2x300xf32>
    tpu.vector_store %arg8[%c0_5, %c0_6], %7 {strides = array<i32>} : memref<2x300xf32, #tpu.memory_space<vmem>>, vector<2x300xf32>,
    %c0_i32_7 = arith.constant 0 : i32
    %9 = arith.cmpi eq, %arg1, %c0_i32_7 : i32
    %10 = arith.extui %9 : i1 to i32
    %c0_i32_8 = arith.constant 0 : i32
    %11 = arith.cmpi ne, %10, %c0_i32_8 : i32
    scf.if %11 {
      %c0_9 = arith.constant 0 : index
      %c0_10 = arith.constant 0 : index
      %12 = vector.load %arg8[%c0_9, %c0_10] : memref<2x300xf32, #tpu.memory_space<vmem>>, vector<2x300xf32>
      %c0_11 = arith.constant 0 : index
      %c0_12 = arith.constant 0 : index
      %13 = vector.load %arg3[%c0_11, %c0_12] : memref<300x32xf32, #tpu.memory_space<vmem>>, vector<300x32xf32>
      %cst_13 = arith.constant dense<0.000000e+00> : vector<2x32xf32>
      %14 = tpu.matmul %12, %13, %cst_13 {dimension_numbers = #tpu.dot_dimension_numbers<[1], [0], [0], [1], [0, 0, 1, 1], [], []>} : vector<2x300xf32>, vector<300x32xf32>, vector<2x32xf32> -> vector<2x32xf32>
      %c0_14 = arith.constant 0 : index
      %c0_15 = arith.constant 0 : index
      %15 = vector.load %arg4[%c0_14, %c0_15] : memref<1x32xf32, #tpu.memory_space<vmem>>, vector<1x32xf32>
      %16 = vector.broadcast %15 : vector<1x32xf32> to vector<2x32xf32>
      %17 = arith.addf %14, %16 : vector<2x32xf32>
      %cst_16 = arith.constant 0.000000e+00 : f32
      %18 = vector.broadcast %cst_16 : f32 to vector<2x32xf32>
      %19 = arith.maximumf %17, %18 : vector<2x32xf32>
      %c0_17 = arith.constant 0 : index
      %c0_18 = arith.constant 0 : index
      %20 = vector.load %arg5[%c0_17, %c0_18] : memref<1x32xf32, #tpu.memory_space<vmem>>, vector<1x32xf32>
      %21 = vector.broadcast %20 : vector<1x32xf32> to vector<2x32xf32>
      %22 = arith.mulf %19, %21 : vector<2x32xf32>
      %cst_19 = arith.constant dense<0.000000e+00> : vector<2xf32>
      %23 = vector.multi_reduction <add>, %22, %cst_19 [1] : vector<2x32xf32> to vector<2xf32>
      %24 = vector.shape_cast %23 : vector<2xf32> to vector<1x2xf32>
      %c0_20 = arith.constant 0 : index
      %c0_21 = arith.constant 0 : index
      %25 = vector.load %arg6[%c0_20, %c0_21] : memref<1x1xf32, #tpu.memory_space<vmem>>, vector<1x1xf32>
      %26 = vector.broadcast %25 : vector<1x1xf32> to vector<1x2xf32>
      %27 = arith.addf %24, %26 : vector<1x2xf32>
      %c0_22 = arith.constant 0 : index
      %c0_23 = arith.constant 0 : index
      %28 = vector.load %arg7[%c0_22, %c0_23] : memref<1x2xf32, #tpu.memory_space<vmem>>, vector<1x2xf32>
      tpu.vector_store %arg7[%c0_22, %c0_23], %27 {strides = array<i32>} : memref<1x2xf32, #tpu.memory_space<vmem>>, vector<1x2xf32>,
    } else {
    }
    return
  }
  func.func @transform_0(%arg0: i32, %arg1: i32) -> (i32, i32, i32) {
    %c0_i32 = arith.constant 0 : i32
    %c0_i32_0 = arith.constant 0 : i32
    return %arg0, %arg1, %c0_i32 : i32, i32, i32
  }
  func.func @transform_1(%arg0: i32, %arg1: i32) -> (i32, i32) {
    %c0_i32 = arith.constant 0 : i32
    %c0_i32_0 = arith.constant 0 : i32
    %c0_i32_1 = arith.constant 0 : i32
    return %c0_i32, %c0_i32_0 : i32, i32
  }
  func.func @transform_2(%arg0: i32, %arg1: i32) -> (i32, i32) {
    %c0_i32 = arith.constant 0 : i32
    %c0_i32_0 = arith.constant 0 : i32
    %c0_i32_1 = arith.constant 0 : i32
    return %c0_i32, %c0_i32_0 : i32, i32
  }
  func.func @transform_3(%arg0: i32, %arg1: i32) -> (i32, i32) {
    %c0_i32 = arith.constant 0 : i32
    %c0_i32_0 = arith.constant 0 : i32
    %c0_i32_1 = arith.constant 0 : i32
    return %c0_i32, %c0_i32_0 : i32, i32
  }
  func.func @transform_4(%arg0: i32, %arg1: i32) -> (i32, i32) {
    %c0_i32 = arith.constant 0 : i32
    %c0_i32_0 = arith.constant 0 : i32
    %c0_i32_1 = arith.constant 0 : i32
    return %c0_i32, %c0_i32_0 : i32, i32
  }
  func.func @transform_5(%arg0: i32, %arg1: i32) -> (i32, i32) {
    %c0_i32 = arith.constant 0 : i32
    %c0_i32_0 = arith.constant 0 : i32
    return %c0_i32, %arg0 : i32, i32
  }
}

</mosaic_0001>

<bundles_post_ra>
// kernel: tpu_custom_call.1
= control target key start
LH: loop header
LB: loop body
LE: loop exit
PB: predicated region body
PF: predicated region fallthrough
CT: control target
= control target key end

     0   :  { %s767_s0 = inlined_call_operand.vmem [shape: bf16[2,8,300], index: 0, kind: input, shape index: {}]   ;;  %s768_s1 = inlined_call_operand.vmem [shape: f32[300,32], index: 1, kind: input, shape index: {}]   ;;  %s769_s2 = inlined_call_operand.vmem [shape: f32[1,32], index: 2, kind: input, shape index: {}]   ;;  %s770_s3 = inlined_call_operand.vmem [shape: f32[1,32], index: 3, kind: input, shape index: {}]   ;;  %s771_s4 = inlined_call_operand.<no memory space> [shape: f32[1,1], index: 4, kind: input, shape index: {}]   ;;  %s772_s5 = inlined_call_operand.hbm [shape: f32[1,2], index: 5, kind: output, shape index: {}]  }
   0x1   :  { %v10_v0 = vstv %s771_s4 }
   0x2   :  { %11 = vst [vmem:[#allocation3] sm:$0x1] %v10_v0 }
   0x3   :  { %v162_v1 = vld [vmem:[%s768_s1 + $0x80] sm:$0xff]  ;;  %v163_v2 = vld [vmem:[%s768_s1 + $0x88] sm:$0xff]  ;;  %v164_v6 = vld [vmem:[%s768_s1 + $0x90] sm:$0xff]  ;;  %v540_v8 = vmov 0.0|0.0   ;;  %vm541_vm0 = vmmov 0   ;;  %v542_v21 = vmov 0.0   ;;  %v93_v39 = vlaneseq }
   0x4   :  { %v146_v3 = vld [vmem:[%s768_s1] sm:$0xff]  ;;  %v465_v4 = vpack.c.bf16 %v163_v2, %v162_v1  ;;  %v147_v5 = vld [vmem:[%s768_s1 + $0x8] sm:$0xff]  ;;  %v165_v7 = vld [vmem:[%s768_s1 + $0x98] sm:$0xff]  ;;  %497 = vmatprep.subr.bf16.mxu1 %v540_v8  ;;  %462 = vmatprep.mubr.msk.f32.mxu1 %vm541_vm0, %v542_v21  ;;  %vm27_vm1 = vcmask 1041408   ;;  %vm28_vm2 = vcmask 1043458   ;;  %vm30_vm3 = vcmask 357380  }
   0x5   :  { %v467_v9 = vpack.c.bf16 %v147_v5, %v146_v3  ;;  %v469_v10 = vpack.c.bf16 %v165_v7, %v164_v6  ;;  %v148_v11 = vld [vmem:[%s768_s1 + $0x10] sm:$0xff]  ;;  %v149_v12 = vld [vmem:[%s768_s1 + $0x18] sm:$0xff]  ;;  %v166_v13 = vld [vmem:[%s768_s1 + $0xa0] sm:$0xff]  ;;  %vm56_vm4 = vcmask 359424   ;;  %v543_v37 = vmov 1983009808  }
   0x6   :  { %466 = vmatprep.subr.bf16.mxu0 %v465_v4  ;;  %v167_v14 = vld [vmem:[%s768_s1 + $0xa8] sm:$0xff]  ;;  %v471_v15 = vpack.c.bf16 %v149_v12, %v148_v11  ;;  %v150_v17 = vld [vmem:[%s768_s1 + $0x20] sm:$0xff]  ;;  %v168_v19 = vld [vmem:[%s768_s1 + $0xb0] sm:$0xff]  ;;  %v667_v38 = vunpack.c.l.s4 %v543_v37  ;;  %vm212_vm5 = vcmask 1043456  }
   0x7   :  { %468 = vmatpush3.bf16.msra.mxu0 %v467_v9  ;;  %v473_v16 = vpack.c.bf16 %v167_v14, %v166_v13  ;;  %v151_v18 = vld [vmem:[%s768_s1 + $0x28] sm:$0xff]  ;;  %v169_v20 = vld [vmem:[%s768_s1 + $0xb8] sm:$0xff]  ;;  %v152_v23 = vld [vmem:[%s768_s1 + $0x30] sm:$0xff] }
   0x8   :  { %470 = vmatprep.subr.bf16.mxu0 %v469_v10  ;;  %v475_v22 = vpack.c.bf16 %v151_v18, %v150_v17  ;;  %v153_v24 = vld [vmem:[%s768_s1 + $0x38] sm:$0xff]  ;;  %v170_v25 = vld [vmem:[%s768_s1 + $0xc0] sm:$0xff]  ;;  %v477_v26 = vpack.c.bf16 %v169_v20, %v168_v19  ;;  %v171_v27 = vld [vmem:[%s768_s1 + $0xc8] sm:$0xff] }
   0x9   :  { %v178_v28 = vld [vmem:[%s768_s1 + $0x100] sm:$0xff]  ;;  %v179_v29 = vld [vmem:[%s768_s1 + $0x108] sm:$0xff]  ;;  %v654_v32 = vld [vmem:[%s768_s1 + $0xd0] sm:$0xff]  ;;  %v479_v40 = vpack.c.bf16 %v153_v24, %v152_v23  ;;  %v481_v41 = vpack.c.bf16 %v171_v27, %v170_v25 }
   0xa   :  { %v644_v30 = vld [vmem:[%s768_s1 + $0x40] sm:$0xff]  ;;  %v649_v31 = vld [vmem:[%s768_s1 + $0x48] sm:$0xff]  ;;  %v498_v33 = vpack.c.bf16 %v179_v29, %v178_v28  ;;  %v659_v34 = vld [vmem:[%s768_s1 + $0xd8] sm:$0xff] }
   0xb   :  { %472 = vmatpush3.bf16.msra.mxu0 %v471_v15  ;;  %v180_v35 = vld [vmem:[%s768_s1 + $0x110] sm:$0xff]  ;;  %v181_v36 = vld [vmem:[%s768_s1 + $0x118] sm:$0xff]  ;;  %vm29_vm6 = vmor %vm28_vm2, %vm27_vm1  ;;  %v483_v51 = vpack.c.bf16 %v649_v31, %v644_v30  ;;  %v485_v52 = vpack.c.bf16 %v659_v34, %v654_v32 }
   0xc   :  { %474 = vmatprep.subr.bf16.mxu0 %v473_v16  ;;  %499 = vmatpush3.bf16.msra.mxu1 %v498_v33  ;;  %v501_v42 = vpack.c.bf16 %v181_v36, %v180_v35  ;;  %v33_v43 = vld [vmem:[%s767_s0] sm:$0xff]  ;;  %v34_v44 = vld [vmem:[%s767_s0 + $0x8] ss:$12 sps:$4 sm:$0xff]   ;;  %vm679_vm7 = vmor %vm30_vm3, %vm29_vm6 }
   0xd   :  { %500 = vmatprep.subr.bf16.mxu1 %v540_v8  ;;  %v35_v46 = vld [vmem:[%s767_s0 + $0xc] sm:$0xff]  ;;  %v37_v47 = vunpack.c.l.bf16 %v33_v43  ;;  %v38_v48 = vunpack.c.h.bf16 %v33_v43  ;;  %v39_v49 = vunpack.c.l.bf16 %v34_v44  ;;  %v42_v50 = vunpack.c.h.bf16 %v34_v44  ;;  %32 = vst.msk [vmem:[#allocation2] sm:$0x3f] %vm679_vm7, %v542_v21  ;;  %v182_v55 = vld [vmem:[%s768_s1 + $0x120] sm:$0xff]  ;;  %v183_v56 = vld [vmem:[%s768_s1 + $0x128] sm:$0xf] }
   0xe   :  { %v40_v53 = vunpack.c.l.bf16 %v35_v46  ;;  %v41_v54 = vunpack.c.h.bf16 %v35_v46 }
   0xf   :  { %476 = vmatpush3.bf16.msra.mxu0 %v475_v22  ;;  %v44_v57 = vrot.slane %v37_v47, 4  ;;  %v50_v58 = vrot.slane %v38_v48, 4  ;;  %v57_v59 = vsel %vm56_vm4, %v39_v49, 0.0  ;;  %v76_v60 = vsel %vm56_vm4, %v42_v50, 0.0 }
  0x10   :  { %478 = vmatprep.subr.bf16.mxu0 %v477_v26 }
  0x11   :  { %12 = vsyncpa [#allocation5], 0  ;;  %v156_v61 = vld [vmem:[%s768_s1 + $0x50] sm:$0xff]  ;;  %v157_v62 = vld [vmem:[%s768_s1 + $0x58] sm:$0xff]  ;;  %502 = vmatpush3.bf16.msra.mxu1 %v501_v42  ;;  %v58_v63 = vrot.slane %v57_v59, 4  ;;  %v64_v0 = vrot.slane %v40_v53, 4  ;;  %v45_v3 = vadd.f32 %v44_v57, %v37_v47  ;;  %v51_v4 = vadd.f32 %v50_v58, %v38_v48 }
  0x12   :  { %v70_v1 = vrot.slane %v41_v54, 4  ;;  %v77_v2 = vrot.slane %v76_v60, 4  ;;  %v707_v5 = vshrl.u32 %v93_v39, 7  ;;  %503 = vmatprep.subr.bf16.mxu1 %v540_v8  ;;  %v504_v6 = vpack.c.bf16 %v183_v56, %v182_v55  ;;  %v174_v9 = vld [vmem:[%s768_s1 + $0xe0] sm:$0xff]  ;;  %v175_v10 = vld [vmem:[%s768_s1 + $0xe8] sm:$0xff]  ;;  %v176_v27 = vld [vmem:[%s768_s1 + $0xf0] sm:$0xff] }
  0x13   :  { %480 = vmatpush3.bf16.msra.mxu0 %v479_v40  ;;  %vm544_vm8 = vmmov 1   ;;  %v59_v11 = vadd.f32 %v58_v63, %v57_v59  ;;  %v65_v12 = vadd.f32 %v64_v0, %v40_v53  ;;  %v487_v8 = vpack.c.bf16 %v157_v62, %v156_v61  ;;  %v158_v18 = vld [vmem:[%s768_s1 + $0x60] sm:$0xff]  ;;  %v159_v19 = vld [vmem:[%s768_s1 + $0x68] sm:$0xff]  ;;  %v177_v28 = vld [vmem:[%s768_s1 + $0xf8] sm:$0xff] }
  0x14   :  { %482 = vmatprep.subr.bf16.mxu0 %v481_v41  ;;  %vm711_vm9 = vmpackc.low %vm212_vm5, %vm544_vm8  ;;  %v71_v13 = vadd.f32 %v70_v1, %v41_v54  ;;  %v78_v14 = vadd.f32 %v77_v2, %v76_v60  ;;  %v46_v15 = vrot.slane %v45_v3, 2  ;;  %v52_v16 = vrot.slane %v51_v4, 2  ;;  %v160_v43 = vld [vmem:[%s768_s1 + $0x70] sm:$0xff]  ;;  %v161_v44 = vld [vmem:[%s768_s1 + $0x78] sm:$0xff] }
  0x15   :  { %v92_v17 = vunpack.c.0.s8 %v667_v38  ;;  %v60_v20 = vrot.slane %v59_v11, 2  ;;  %v66_v21 = vrot.slane %v65_v12, 2  ;;  %506 = vmatpush3.bf16.msk.msra.mxu1 %vm711_vm9, %v504_v6  ;;  %v489_v24 = vpack.c.bf16 %v175_v10, %v174_v9  ;;  %v43_v63 = vld [vmem:[#allocation2] sm:$0x3f] }
  0x16   :  { %v72_v22 = vrot.slane %v71_v13, 2  ;;  %v79_v23 = vrot.slane %v78_v14, 2  ;;  %v47_v25 = vadd.f32 %v46_v15, %v45_v3  ;;  %v53_v26 = vadd.f32 %v52_v16, %v51_v4  ;;  %v404_v45 = vld [vmem:[%s769_s2] ss:$0 sm:$0xff]  ;;  %s546_s2 = smov [#allocation4]  }
  0x17   :  { %484 = vmatpush3.bf16.msra.mxu0 %v483_v51  ;;  %v61_v29 = vadd.f32 %v60_v20, %v59_v11  ;;  %v67_v30 = vadd.f32 %v66_v21, %v65_v12  ;;  %v491_v33 = vpack.c.bf16 %v159_v19, %v158_v18  ;;  %v95_v36 = vsub.s32 %v92_v17, %v707_v5  ;;  %v407_v18 = vld [vmem:[%s770_s3] ss:$0 sm:$0xff]  ;;  %s396_s26 = sshll.u32 %s546_s2, 4  ;;  %s397_s26 = int_to_ptr.vmem [resolvable:$true] %s396_s26 }
  0x18   :  { %486 = vmatprep.subr.bf16.mxu0 %v485_v52  ;;  %v73_v31 = vadd.f32 %v72_v22, %v71_v13  ;;  %v80_v32 = vadd.f32 %v79_v23, %v78_v14  ;;  %v48_v34 = vrot.slane %v47_v25, 1  ;;  %v54_v35 = vrot.slane %v53_v26, 1  ;;  %v369_v22 = vld [vmem:[#allocation3] sm:$0x1]  ;;  %s516_s3 = scalar_lea.vmem %s397_s26, 16  ;;  %s520_s27 = scalar_lea.vmem %s397_s26, 32 }
  0x19   :  { %v62_v37 = vrot.slane %v61_v29, 1  ;;  %v68_v38 = vrot.slane %v67_v30, 1  ;;  %v493_v42 = vpack.c.bf16 %v177_v28, %v176_v27  ;;  %v495_v53 = vpack.c.bf16 %v161_v44, %v160_v43  ;;  %p517_p0 = scmp.ne.s32.totalorder %s397_s26, %s516_s3  ;;  %p521_p1 = scmp.lt.s32.totalorder %s397_s26, %s397_s26 }
  0x1a   :  { %v74_v40 = vrot.slane %v73_v31, 1  ;;  %v81_v41 = vrot.slane %v80_v32, 1  ;;  %v49_v46 = vadd.f32 %v48_v34, %v47_v25  ;;  %v55_v47 = vadd.f32 %v54_v35, %v53_v26  ;;  %p522_p2 = scmp.lt.s32.totalorder %s520_s27, %s516_s3 }
  0x1b   :  { %488 = vmatpush3.bf16.msra.mxu0 %v487_v8  ;;  %v63_v48 = vadd.f32 %v62_v37, %v61_v29  ;;  %v69_v49 = vadd.f32 %v68_v38, %v67_v30  ;;  %vm126_vm10 = vcmask 1041409   ;;  %vm128_vm11 = vcmask 1043459  }
  0x1c   :  { %490 = vmatprep.subr.bf16.mxu0 %v489_v24  ;;  %v75_v50 = vadd.f32 %v74_v40, %v73_v31  ;;  %v82_v51 = vadd.f32 %v81_v41, %v80_v32  ;;  %v89_v52 = vcombine.low %v49_v46, %v55_v47  ;;  %vm130_vm12 = vcmask 1045509   ;;  %p523_p3 = por %p522_p2, %p521_p1 }
  0x1d   :  { %v103_v54 = vrot.slane %v63_v48, %v95_v36  ;;  %vm132_vm13 = vcmask 1047559   ;;  %v545_v11 = vmov 0   ;;  %vm365_vm14 = vcmask 254976  }
  0x1e   :  { %v105_v55 = vcombine.low %v69_v49, %v75_v50  ;;  %v119_v56 = vrot.slane %v82_v51, %v95_v36  ;;  %v96_v57 = vrot.slane %v89_v52, %v95_v36  ;;  %514 = vset.pattern.permute.xlu0 %v545_v11  ;;  %v377_v24 = vsub.s32 0, %v707_v5  ;;  %p524_p4 = pnand %p523_p3, %p517_p0 }
  0x1f   :  { %492 = vmatpush3.bf16.msra.mxu0 %v491_v33  ;;  %v382_v25 = vand.u32 127, %v93_v39  ;;  %vm388_vm15 = vcmask 8192  }
  0x20   :  { %494 = vmatprep.subr.bf16.mxu0 %v493_v42  ;;  %v112_v58 = vrot.slane %v105_v55, %v95_v36  ;;  %v104_v59 = vcombine.low %v96_v57, %v103_v54 }
  0x21   :  { %v385_v28 = vsub.s32 %v382_v25, %v707_v5 }
  0x22   :  { %v120_v60 = vcombine.low %v112_v58, %v119_v56 }
  0x23   :  { %496 = vmatpush3.bf16.msra.mxu0 %v495_v53 }
  0x24   :  { %v125_v61 = vrot.slane %v120_v60, 7 }
  0x26   :  { %v127_v62 = vsel %vm126_vm10, %v125_v61, %v104_v59 }
  0x27   :  { %v129_v0 = vsel %vm128_vm11, %v125_v61, %v127_v62 }
  0x28   :  { %v131_v1 = vsel %vm130_vm12, %v125_v61, %v129_v0 }
  0x29   :  { %v133_v2 = vsel %vm132_vm13, %v125_v61, %v131_v1 }
  0x2a   :  { %v135_v3 = vadd.f32 %v133_v2, %v43_v63 }
  0x2c   :  { %141 = vst.msk [vmem:[#allocation2] sm:$0x3f] %vm679_vm7, %v135_v3 }
  0x33   :  { %v145_v4 = vld [vmem:[#allocation2] sm:$0x3f] }
  0x34   :  { %v192_v6 = vcombine.high %v145_v4, %v145_v4  ;;  %v199_v7 = vrot.slane %v145_v4, %v95_v36 }
  0x36   :  { %v206_v9 = vrot.slane %v192_v6, %v95_v36  ;;  %v207_v10 = vcombine.high %v199_v7, %v199_v7 }
  0x38   :  { %280 = vmatprep.mubr.f32.mxu0 %v207_v10  ;;  %463 = vmatmul.mubr.msk.f32.vlgmr.msra.gmra.mrb[0].mxu1 %vm56_vm4, %v206_v9 }
  0x39   :  { %281 = vmatmul.mubr.f32.vlgmr.msra.gmra.mrb[0].mxu0 %v199_v7 }
 0x10b   :  { %v352_v12 = vpop.f32.mrb[0].mxu1 }
 0x10c   :  { %v440_v13 = vpop.f32.mrb[0].mxu0  ;;  %v464_v14 = vpop.f32.mrb[1].mxu1 }
 0x10d   :  { %v441_v8 = vpop.f32.mrb[1].mxu0 }
 0x10e   :  { %v442_v15 = vadd.f32 %v441_v8, %v440_v13 }
 0x110   :  { %v283_v16 = vadd.f32 %v442_v15, %v404_v45 }
 0x112   :  { %v353_v17 = vadd.f32 %v352_v12, %v283_v16 }
 0x114   :  { %v356_v19 = vmax.f32 %v353_v17, 0.0 }
 0x116   :  { %v364_v20 = vmul.f32 %v407_v18, %v356_v19 }
 0x118   :  { %v366_v21 = vsel %vm365_vm14, %v364_v20, 0.0 }
 0x119   :  { %367 = vadd.xlane.f32.xlu0 %v366_v21 }
 0x12f   :  { %372 = vperm.xlu0 %514, %v369_v22  }
 0x1a6   :  { %v368_v23 = vpop.xlane.xlu0 %367 }
 0x1ae   :  { %v373_v26 = vpop.permute.xlu0 %372 }
 0x1af   :  { %v378_v27 = vrot.slane %v373_v26, %v377_v24 }
 0x1b1   :  { %v379_v29 = vadd.f32 %v378_v27, %v368_v23 }
 0x1b3   :  { %v386_v30 = vrot.slane %v379_v29, %v385_v28 }
 0x1b5   :  { %389 = vst.msk [vmem:[#allocation4] sm:$0x1] %vm388_vm15, %v386_v30 }
 0x1b6   :  { %527 = shalt.err (!%p524_p4)
}
 0x1b7   :  { %s528_s4 = scalar_lea.hbm %s772_s5, 16 }
 0x1b8   :  { %p529_p5 = scmp.ne.s32.totalorder %s772_s5, %s528_s4  ;;  %p532_p6 = scmp.lt.u32.totalorder %s528_s4, %s772_s5 }
 0x1ba   :  { %p534_p7 = pnand %p532_p6, %p529_p5 }
 0x1bc   :  { %537 = shalt.err (!%p534_p7)
}
 0x1bd   :  { %399 = dma.vmem_to_hbm [thread:$0]  %s397_s26, 16, %s772_s5, [#allocation5]  }
 0x1be   :  { %538 = dma.done.wait [#allocation5], 16  }
 0x1bf   :  { %539 = vsyncadd [#allocation5], 4294967280 }
 0x1c0   :  { %403 = vsyncpa [#allocation5], 1 }

</bundles_post_ra>
